<compile_context>
chip_gen: v7x
topology: tpu7x:2x2x1
jax: 0.10.0
libtpu: 0.0.40
codegen_flags: <defaults>
</compile_context>

<pallas_src>
import jax
import jax.numpy as jnp
from jax.experimental import pallas as pl
from jax.experimental.pallas import tpu as pltpu


def _round_up(x, m):
    return ((x + m - 1) // m) * m


def _decoder_kernel(wcomb_t_ref, r_t_ref, p_t_ref, o_ref):
    """Fused: relu( W_comb^T @ (r^T ⊙ p^T) ).  One edge column-block per step."""
    rp = r_t_ref[...].astype(jnp.float32) * p_t_ref[...].astype(jnp.float32)  # (Dp, be)  VPU
    out = jnp.dot(wcomb_t_ref[...], rp,
                  preferred_element_type=jnp.float32)                          # (Cp, be)  MXU
    o_ref[...] = jnp.maximum(out, 0.0).astype(o_ref.dtype)                     # ReLU epilogue


def decoder_forward(rna_inputs, protein_inputs, rna_indices, protein_indices,
                    w_relation, weight_classifier, *, block_e=2048):
    """Decoder.forward (dropout=0.0 identity, activation=relu)."""
    # Gather + transpose to the lane-dense (D, E) layout (kept in source dtype).
    r_t = jnp.transpose(rna_inputs[rna_indices])           # (D, E)
    p_t = jnp.transpose(protein_inputs[protein_indices])   # (D, E)

    D, E = r_t.shape
    c_out = weight_classifier.shape[1]                      # num_classes

    # Collapse the two weight matrices (exact for the dropout=0 inference path):
    #   basis @ W_cls == (r⊙p) @ (W_rel^T @ W_cls);   here we build its transpose.
    w_comb_t = weight_classifier.astype(jnp.float32).T @ w_relation.astype(jnp.float32)  # (C, D)

    # Sublane-pad the tiny dims (zeros contribute nothing; relu(0)=0 in pad rows).
    d_pad = _round_up(D, 8)
    c_pad = _round_up(c_out, 8)
    w_comb_t_p = jnp.zeros((c_pad, d_pad), jnp.float32).at[:c_out, :D].set(w_comb_t)

    # Edge blocking along lanes: multiples of 128; large blocks amortize step overhead.
    be = block_e if E >= block_e else _round_up(E, 128)
    e_pad = _round_up(E, be)
    if (d_pad, e_pad) != (D, E):
        r_t = jnp.pad(r_t, ((0, d_pad - D), (0, e_pad - E)))
        p_t = jnp.pad(p_t, ((0, d_pad - D), (0, e_pad - E)))

    out_t = pl.pallas_call(
        _decoder_kernel,
        out_shape=jax.ShapeDtypeStruct((c_pad, e_pad), jnp.float32),
        grid_spec=pl.GridSpec(
            grid=(e_pad // be,),
            in_specs=[
                pl.BlockSpec((c_pad, d_pad), lambda i: (0, 0)),   # W_comb^T (grid-invariant, DMA'd once)
                pl.BlockSpec((d_pad, be),   lambda i: (0, i)),    # r^T edge block
                pl.BlockSpec((d_pad, be),   lambda i: (0, i)),    # p^T edge block
            ],
            out_specs=pl.BlockSpec((c_pad, be), lambda i: (0, i)),
        ),
        compiler_params=pltpu.CompilerParams(
            dimension_semantics=("parallel",)),
    )(w_comb_t_p, r_t, p_t)

    # Strip padding and return the module's (num_edges, num_classes) layout.
    return jnp.transpose(out_t[:c_out, :E])


def reference_decoder(rna_inputs, protein_inputs, rna_indices, protein_indices,
                      w_relation, weight_classifier):
    """Pure-JAX replica of the PyTorch Decoder.forward (dropout=0)."""
    r = rna_inputs[rna_indices]
    p = protein_inputs[protein_indices]
    basis = []
    for i in range(w_relation.shape[0]):
        basis.append(jnp.sum(r * w_relation[i, :] * p, axis=1, keepdims=True))
    basis = jnp.concatenate(basis, axis=1)
    out = basis @ weight_classifier
    return jax.nn.relu(out)


def _kaiming_uniform(key, shape):
    fan_in = shape[1]
    bound = (6.0 / fan_in) ** 0.5
    return jax.random.uniform(key, shape, jnp.float32, minval=-bound, maxval=bound)


if __name__ == "__main__":
    # Module config: input_dim=32, num_classes=4 (num_weights must equal
    # num_classes for the forward's matmul to be shape-valid), activation=relu.
    input_dim = 32
    num_classes = 4
    num_weights = num_classes
    n_rna, n_prot, num_edges = 16, 8, 64

    key = jax.random.PRNGKey(0)
    k = jax.random.split(key, 6)
    rna_inputs = jax.random.normal(k[0], (n_rna, input_dim), jnp.float32)
    protein_inputs = jax.random.normal(k[1], (n_prot, input_dim), jnp.float32)
    rna_indices = jax.random.randint(k[2], (num_edges,), 0, n_rna, dtype=jnp.int32)
    protein_indices = jax.random.randint(k[3], (num_edges,), 0, n_prot, dtype=jnp.int32)
    w_relation = _kaiming_uniform(k[4], (num_classes, input_dim))
    weight_classifier = _kaiming_uniform(k[5], (num_weights, num_classes))

    out = decoder_forward(rna_inputs, protein_inputs, rna_indices, protein_indices,
                          w_relation, weight_classifier)
    jax.block_until_ready(out)

    ref = reference_decoder(rna_inputs, protein_inputs, rna_indices, protein_indices,
                            w_relation, weight_classifier)
    assert out.shape == (num_edges, num_classes)
    # rtol slightly loosened: the (exact) W_rel^T·W_cls collapse reassociates the
    # f32 reductions, giving sub-1e-5 rounding differences vs. the two-stage form.
    assert jnp.allclose(out, ref, atol=1e-5, rtol=1e-4)

    print("KERNEL_OK")
</pallas_src>

<mosaic_0001>
module attributes {stable_mosaic.version = 11 : i64} {
  func.func @_decoder_kernel(%arg0: i32, %arg1: memref<8x32xf32, #tpu.memory_space<vmem>>, %arg2: memref<32x128xf32, #tpu.memory_space<vmem>>, %arg3: memref<32x128xf32, #tpu.memory_space<vmem>>, %arg4: memref<8x128xf32, #tpu.memory_space<vmem>>) attributes {dimension_semantics = [#tpu.dimension_semantics<parallel>], iteration_bounds = array<i64: 1>, scalar_prefetch = 0 : i64, scratch_operands = 0 : i64, tpu.core_type = #tpu.core_type<tc>, window_params = [{pipeline_mode = #tpu.pipeline_mode<synchronous>, transform_indices = @transform_0, window_bounds = array<i64: 8, 32>}, {transform_indices = @transform_1, window_bounds = array<i64: 32, 128>}, {transform_indices = @transform_2, window_bounds = array<i64: 32, 128>}, {transform_indices = @transform_3, window_bounds = array<i64: 8, 128>}]} {
    %c0 = arith.constant 0 : index
    %c0_0 = arith.constant 0 : index
    %0 = vector.load %arg2[%c0, %c0_0] : memref<32x128xf32, #tpu.memory_space<vmem>>, vector<32x128xf32>
    %c0_1 = arith.constant 0 : index
    %c0_2 = arith.constant 0 : index
    %1 = vector.load %arg3[%c0_1, %c0_2] : memref<32x128xf32, #tpu.memory_space<vmem>>, vector<32x128xf32>
    %2 = arith.mulf %0, %1 : vector<32x128xf32>
    %c0_3 = arith.constant 0 : index
    %c0_4 = arith.constant 0 : index
    %3 = vector.load %arg1[%c0_3, %c0_4] : memref<8x32xf32, #tpu.memory_space<vmem>>, vector<8x32xf32>
    %cst = arith.constant dense<0.000000e+00> : vector<8x128xf32>
    %4 = tpu.matmul %3, %2, %cst {dimension_numbers = #tpu.dot_dimension_numbers<[1], [0], [0], [1], [0, 0, 1, 1], [], []>} : vector<8x32xf32>, vector<32x128xf32>, vector<8x128xf32> -> vector<8x128xf32>
    %cst_5 = arith.constant 0.000000e+00 : f32
    %5 = vector.broadcast %cst_5 : f32 to vector<8x128xf32>
    %6 = arith.maximumf %4, %5 : vector<8x128xf32>
    %c0_6 = arith.constant 0 : index
    %c0_7 = arith.constant 0 : index
    %7 = vector.load %arg4[%c0_6, %c0_7] : memref<8x128xf32, #tpu.memory_space<vmem>>, vector<8x128xf32>
    tpu.vector_store %arg4[%c0_6, %c0_7], %6 {strides = array<i32>} : memref<8x128xf32, #tpu.memory_space<vmem>>, vector<8x128xf32>,
    return
  }
  func.func @transform_0(%arg0: i32) -> (i32, i32) {
    %c0_i32 = arith.constant 0 : i32
    %c0_i32_0 = arith.constant 0 : i32
    %c0_i32_1 = arith.constant 0 : i32
    return %c0_i32, %c0_i32_0 : i32, i32
  }
  func.func @transform_1(%arg0: i32) -> (i32, i32) {
    %c0_i32 = arith.constant 0 : i32
    %c0_i32_0 = arith.constant 0 : i32
    return %c0_i32, %arg0 : i32, i32
  }
  func.func @transform_2(%arg0: i32) -> (i32, i32) {
    %c0_i32 = arith.constant 0 : i32
    %c0_i32_0 = arith.constant 0 : i32
    return %c0_i32, %arg0 : i32, i32
  }
  func.func @transform_3(%arg0: i32) -> (i32, i32) {
    %c0_i32 = arith.constant 0 : i32
    %c0_i32_0 = arith.constant 0 : i32
    return %c0_i32, %arg0 : i32, i32
  }
}

</mosaic_0001>

<bundles_post_ra>
// kernel: tpu_custom_call.1
= control target key start
LH: loop header
LB: loop body
LE: loop exit
PB: predicated region body
PF: predicated region fallthrough
CT: control target
= control target key end

     0   :  { %8 = vsyncpa [#allocation3], 0  ;;  %s368_s0 = inlined_call_operand.hbm [shape: f32[8,32], index: 0, kind: input, shape index: {}]   ;;  %s369_s1 = inlined_call_operand.hbm [shape: f32[32,128], index: 1, kind: input, shape index: {}]   ;;  %s370_s2 = inlined_call_operand.hbm [shape: f32[32,128], index: 2, kind: input, shape index: {}]   ;;  %s371_s3 = inlined_call_operand.hbm [shape: f32[8,128], index: 3, kind: output, shape index: {}]  }
   0x1   :  { %9 = vsyncpa [#allocation6], 0 }
   0x2   :  { %10 = vsyncpa [#allocation4], 0  ;;  %s285_s12 = smov [#allocation5]   ;;  %s191_s16 = scalar_lea.hbm %s369_s1, 512 }
   0x3   :  { %s26_s13 = sshll.u32 %s285_s12, 4  ;;  %p192_p0 = scmp.ne.s32.totalorder %s369_s1, %s191_s16  ;;  %s27_s13 = int_to_ptr.vmem [resolvable:$true] %s26_s13 }
   0x4   :  { %p195_p1 = scmp.lt.u32.totalorder %s191_s16, %s369_s1 }
   0x6   :  { %p197_p2 = pnand %p195_p1, %p192_p0 }
   0x8   :  { %200 = shalt.err (!%p197_p2)
}
   0x9   :  { %s201_s21 = scalar_lea.vmem %s27_s13, 512  ;;  %p206_p4 = scmp.lt.s32.totalorder %s27_s13, %s27_s13 }
   0xa   :  { %p202_p3 = scmp.ne.s32.totalorder %s27_s13, %s201_s21  ;;  %p207_p5 = scmp.lt.s32.totalorder %s201_s21, %s201_s21 }
   0xc   :  { %p208_p6 = por %p207_p5, %p206_p4 }
   0xe   :  { %p209_p7 = pnand %p208_p6, %p202_p3 }
  0x10   :  { %212 = shalt.err (!%p209_p7)
}
  0x11   :  { %s286_s22 = smov 128   ;;  %s287_s23 = smov 8  }
  0x12   :  { %32 = dma.hbm_to_vmem [thread:$0]  %s369_s1, 512, %s27_s13, [#allocation6], %s286_s22, %s286_s22, %s287_s23  }
  0x13   :  { %s288_s26 = smov [#allocation2]   ;;  %s289_s28 = smov [#allocation7]  }
  0x14   :  { %s17_s27 = sshll.u32 %s288_s26, 4  ;;  %s38_s29 = sshll.u32 %s289_s28, 4  ;;  %s18_s27 = int_to_ptr.vmem [resolvable:$true] %s17_s27  ;;  %s39_s29 = int_to_ptr.vmem [resolvable:$true] %s38_s29 }
  0x15   :  { %s213_s5 = scalar_lea.hbm %s368_s0, 128 }
  0x16   :  { %p214_p8 = scmp.ne.s32.totalorder %s368_s0, %s213_s5  ;;  %p217_p9 = scmp.lt.u32.totalorder %s213_s5, %s368_s0 }
  0x18   :  { %p219_p10 = pnand %p217_p9, %p214_p8 }
  0x1a   :  { %222 = shalt.err (!%p219_p10)
}
  0x1b   :  { %s223_s1 = scalar_lea.vmem %s18_s27, 128  ;;  %p228_p12 = scmp.lt.s32.totalorder %s18_s27, %s18_s27 }
  0x1c   :  { %p224_p11 = scmp.ne.s32.totalorder %s18_s27, %s223_s1  ;;  %p229_p13 = scmp.lt.s32.totalorder %s223_s1, %s223_s1 }
  0x1e   :  { %p230_p0 = por %p229_p13, %p228_p12 }
  0x20   :  { %p231_p1 = pnand %p230_p0, %p224_p11 }
  0x22   :  { %234 = shalt.err (!%p231_p1)
}
  0x23   :  { %20 = dma.hbm_to_vmem [thread:$0]  %s368_s0, 128, %s18_s27, [#allocation3]  }
  0x24   :  { %s235_s14 = scalar_lea.hbm %s370_s2, 512 }
  0x25   :  { %p236_p2 = scmp.ne.s32.totalorder %s370_s2, %s235_s14  ;;  %p239_p3 = scmp.lt.u32.totalorder %s235_s14, %s370_s2 }
  0x27   :  { %p241_p4 = pnand %p239_p3, %p236_p2 }
  0x29   :  { %244 = shalt.err (!%p241_p4)
}
  0x2a   :  { %s245_s19 = scalar_lea.vmem %s39_s29, 512  ;;  %p250_p6 = scmp.lt.s32.totalorder %s39_s29, %s39_s29 }
  0x2b   :  { %p246_p5 = scmp.ne.s32.totalorder %s39_s29, %s245_s19  ;;  %p251_p7 = scmp.lt.s32.totalorder %s245_s19, %s245_s19 }
  0x2d   :  { %p252_p8 = por %p251_p7, %p250_p6 }
  0x2f   :  { %p253_p9 = pnand %p252_p8, %p246_p5 }
  0x31   :  { %256 = shalt.err (!%p253_p9)
}
  0x32   :  { %44 = dma.hbm_to_vmem [thread:$0]  %s370_s2, 512, %s39_s29, [#allocation6], %s286_s22, %s286_s22, %s287_s23  }
  0x33   :  { %279 = dma.done.wait [#allocation3], 128  }
  0x34   :  { %280 = vsyncadd [#allocation3], 4294967168 }
  0x35   :  { %281 = dma.done.wait [#allocation6], 1024  }
  0x36   :  { %282 = vsyncadd [#allocation6], 4294966272  ;;  %v290_v0 = vmov 0.0|0.0   ;;  %vm291_vm0 = vmmov 0   ;;  %v292_v1 = vmov 0.0   ;;  %v54_v2 = vld [vmem:[#allocation5] sm:$0xff] }
  0x37   :  { %176 = vmatprep.subr.bf16.mxu0 %v290_v0  ;;  %173 = vmatprep.mubr.msk.f32.mxu0 %vm291_vm0, %v292_v1  ;;  %v55_v3 = vld [vmem:[#allocation5 + $0x8] sm:$0xff]  ;;  %v58_v4 = vld [vmem:[#allocation7] sm:$0xff]  ;;  %v56_v7 = vld [vmem:[#allocation5 + $0x10] sm:$0xff]  ;;  %vm67_vm1 = vcmask 261120   ;;  %s293_s2 = smov [#allocation8]  }
  0x38   :  { %v59_v5 = vld [vmem:[#allocation7 + $0x8] sm:$0xff]  ;;  %v62_v6 = vmul.f32 %v58_v4, %v54_v2  ;;  %v57_v8 = vld [vmem:[#allocation5 + $0x18] sm:$0xff]  ;;  %v60_v10 = vld [vmem:[#allocation7 + $0x10] sm:$0xff]  ;;  %s149_s21 = sshll.u32 %s293_s2, 4  ;;  %s150_s21 = int_to_ptr.vmem [resolvable:$true] %s149_s21 }
  0x39   :  { %v63_v9 = vmul.f32 %v59_v5, %v55_v3  ;;  %v61_v11 = vld [vmem:[#allocation7 + $0x18] sm:$0xff]  ;;  %v64_v12 = vmul.f32 %v60_v10, %v56_v7  ;;  %s257_s22 = scalar_lea.vmem %s150_s21, 128  ;;  %p262_p11 = scmp.lt.s32.totalorder %s150_s21, %s150_s21 }
  0x3a   :  { %v65_v13 = vmul.f32 %v61_v11, %v57_v8  ;;  %v66_v16 = vld [vmem:[#allocation2] sm:$0xff]  ;;  %p258_p10 = scmp.ne.s32.totalorder %s150_s21, %s257_s22  ;;  %p263_p12 = scmp.lt.s32.totalorder %s257_s22, %s257_s22 }
  0x3b   :  { %v177_v14 = vpack.c.bf16 %v63_v9, %v62_v6 }
  0x3c   :  { %v180_v15 = vpack.c.bf16 %v65_v13, %v64_v12  ;;  %p264_p13 = por %p263_p12, %p262_p11 }
  0x3d   :  { %178 = vmatpush3.bf16.msra.mxu0 %v177_v14 }
  0x3e   :  { %179 = vmatprep.subr.bf16.mxu0 %v290_v0  ;;  %p265_p0 = pnand %p264_p13, %p258_p10 }
  0x41   :  { %181 = vmatpush3.bf16.msra.mxu0 %v180_v15 }
  0x44   :  { %174 = vmatmul.mubr.msk.f32.vlgmr.msra.gmra.mrb[0].mxu0 %vm67_vm1, %v66_v16 }
 0x117   :  { %v137_v17 = vpop.f32.mrb[0].mxu0 }
 0x118   :  { %v141_v18 = vmax.f32 %v137_v17, 0.0  ;;  %v175_v19 = vpop.f32.mrb[1].mxu0 }
 0x11a   :  { %142 = vst [vmem:[#allocation8] sm:$0xff] %v141_v18 }
 0x11b   :  { %268 = shalt.err (!%p265_p0)
}
 0x11c   :  { %s269_s25 = scalar_lea.hbm %s371_s3, 128 }
 0x11d   :  { %p270_p1 = scmp.ne.s32.totalorder %s371_s3, %s269_s25  ;;  %p273_p2 = scmp.lt.u32.totalorder %s269_s25, %s371_s3 }
 0x11f   :  { %p275_p3 = pnand %p273_p2, %p270_p1 }
 0x121   :  { %278 = shalt.err (!%p275_p3)
}
 0x122   :  { %152 = dma.vmem_to_hbm [thread:$0]  %s150_s21, 128, %s371_s3, [#allocation4]  }
 0x123   :  { %283 = dma.done.wait [#allocation4], 128  }
 0x124   :  { %284 = vsyncadd [#allocation4], 4294967168 }
 0x125   :  { %156 = vsyncpa [#allocation3], 1 }
 0x126   :  { %157 = vsyncpa [#allocation6], 1 }
 0x127   :  { %158 = vsyncpa [#allocation4], 1 }

</bundles_post_ra>
